<compile_context>
chip_gen: v6e
topology: v6e:2x2x1
jax: 0.10.0
libtpu: 0.0.40
codegen_flags: <defaults>
</compile_context>

<pallas_src>
import jax
import jax.numpy as jnp
from jax import lax
from jax.experimental import pallas as pl
from jax.experimental.pallas import tpu as pltpu


def _caco_kernel(q_ref, w_ref, mb_ref, logit_ref):
    w = w_ref[...]                                   # (dim, tb), W storage dtype
    w32 = w.astype(jnp.float32)                      # norm math always in f32

    # Column-wise squared L2 norm (XLU cross-sublane reduce) + rsqrt (EUP).
    sq = jnp.sum(w32 * w32, axis=0, keepdims=True)   # (1, tb)
    # torch F.normalize clamps the norm at 1e-12  <=>  clamp norm^2 at 1e-24.
    inv = lax.rsqrt(jnp.maximum(sq, 1e-24))          # (1, tb)

    q = q_ref[...]                                   # (tn, dim)
    # Pin the MXU input dtypes explicitly (no implicit mixed-dtype upcast copy).
    if w.dtype == jnp.bfloat16:
        s = jnp.dot(q.astype(jnp.bfloat16), w,
                    preferred_element_type=jnp.float32)        # (tn, tb), f32 acc
    else:
        s = jnp.dot(q.astype(jnp.float32), w32,
                    preferred_element_type=jnp.float32)        # (tn, tb)

    # memory_bank tile is identical for every batch (inner, "arbitrary") step:
    # the output block is resident across that axis, so write it once.
    @pl.when(pl.program_id(1) == 0)
    def _():
        mb_ref[...] = (w32 * inv).astype(mb_ref.dtype)

    logit_ref[...] = (s * inv).astype(logit_ref.dtype)


def _vmem_capacity_bytes():
    try:
        return int(pltpu.get_tpu_info().vmem_capacity_bytes)
    except Exception:
        return 64 * 1024 * 1024      # conservative fallback (v7x per-TC VMEM)


def _pick_tn(n):
    """Batch tile: only tile n when it is large and cleanly divisible."""
    if n <= 512:
        return n
    for cand in (512, 256, 128):
        if n % cand == 0:
            return cand
    return n


def _pick_tb(tn, dim, bank_p, w_itemsize, q_itemsize, logit_itemsize,
             budget_bytes):
    """Lane-aligned W column tile width (bank_p is a multiple of 128)."""
    # Per column-of-tile VMEM:
    #   double-buffered pipeline tiles: W in, mb out (W dtype), logit out
    #   in-kernel f32 temporaries (single copy): w32 + scaled mb, s + scaled logit
    per_col = (2 * dim * w_itemsize            # W input  (x2 buffers)
               + 2 * dim * w_itemsize          # mb output (x2 buffers)
               + 2 * tn * logit_itemsize       # logit output (x2 buffers)
               + 2 * dim * 4                   # w32 + pre-cast scaled mb
               + 2 * tn * 4)                   # s + pre-cast scaled logit
    # q has a constant index_map along the bank axis: fetched once per n tile,
    # not double-buffered against the bank axis; plus one in-kernel cast copy.
    fixed = 2 * tn * dim * max(q_itemsize, 4)
    avail = max(budget_bytes - fixed, 512 * 1024)

    tb = (avail // max(per_col, 1)) // 128 * 128
    # HBM roofline saturates around 512-1024 lanes; >2048 buys nothing and
    # only eats VMEM / compiler headroom.
    tb = min(tb, 2048, bank_p)
    # Aim for >= 8 bank steps when the bank is wide enough: keeps the DMA
    # pipeline overlapped and gives v7x's 2 TensorCores >= 4 tiles each.
    target_steps = min(8, bank_p // 128)
    if target_steps > 0:
        tb = min(tb, max(128, (bank_p // target_steps) // 128 * 128))
    tb = max(tb, 128)
    # bank_p % 128 == 0, so stepping down by 128 always reaches a divisor.
    while bank_p % tb != 0:
        tb -= 128
    return tb


def caco_pn_forward(q, W, *, tb=None, logit_dtype=jnp.float32):
    """Returns (memory_bank, W, logit) matching CaCo_PN.forward.

    Set logit_dtype=jnp.bfloat16 to halve logit writeback HBM traffic when the
    consumer tolerates it (accumulation/scaling stays f32 either way).
    """
    n, dim = q.shape
    dim_w, bank = W.shape
    assert dim == dim_w, "q feature dim must match W rows"

    # Lane-align the bank axis: pad with zero columns (normalize/logit of a
    # zero column is exactly zero) and slice the outputs back.
    bank_p = ((bank + 127) // 128) * 128
    W_p = W if bank_p == bank else jnp.pad(W, ((0, 0), (0, bank_p - bank)))

    tn = _pick_tn(n)
    if n % tn != 0:
        tn = n

    cap = _vmem_capacity_bytes()
    logit_itemsize = jnp.dtype(logit_dtype).itemsize
    if tb is None:
        tb = _pick_tb(tn, dim, bank_p, W.dtype.itemsize, q.dtype.itemsize,
                      logit_itemsize, budget_bytes=int(cap * 0.45))
    assert bank_p % tb == 0, "padded bank_size must be divisible by tile size"

    # Scoped-VMEM limit: cover pipeline buffers + temporaries with margin, but
    # never above ~70% of capacity (Mosaic internal scratch headroom, v7x-safe).
    need = (2 * tn * dim * max(q.dtype.itemsize, 4)
            + tb * (4 * dim * W.dtype.itemsize
                    + 2 * tn * logit_itemsize
                    + 2 * dim * 4
                    + 2 * tn * 4))
    vmem_limit = int(min(cap * 0.7, max(need * 1.5, 32 * 1024 * 1024)))
    vmem_limit = max(vmem_limit, min(int(cap * 0.7), need + (4 << 20)))

    grid = (bank_p // tb, n // tn)        # bank (parallel) outer, batch inner
    mb_p, logit_p = pl.pallas_call(
        _caco_kernel,
        out_shape=(
            jax.ShapeDtypeStruct((dim, bank_p), W.dtype),
            jax.ShapeDtypeStruct((n, bank_p), logit_dtype),
        ),
        grid_spec=pltpu.PrefetchScalarGridSpec(
            num_scalar_prefetch=0,
            grid=grid,
            in_specs=[
                # q depends only on the batch index (constant along the bank
                # axis -> not re-fetched per bank tile).
                pl.BlockSpec((tn, dim), lambda j, i: (i, 0)),
                # W column tile, constant along the batch axis.
                pl.BlockSpec((dim, tb), lambda j, i: (0, j)),
            ],
            out_specs=[
                # memory_bank tile: resident across the inner batch axis.
                pl.BlockSpec((dim, tb), lambda j, i: (0, j)),
                pl.BlockSpec((tn, tb), lambda j, i: (i, j)),      # logit tile
            ],
        ),
        compiler_params=pltpu.CompilerParams(
            dimension_semantics=("parallel", "arbitrary"),
            vmem_limit_bytes=vmem_limit,
        ),
    )(q, W_p)

    mb = mb_p if bank_p == bank else mb_p[:, :bank]
    logit = logit_p if bank_p == bank else logit_p[:, :bank]
    return mb, W, logit


if __name__ == "__main__":
    # Small, deterministic setup consistent with the module: bank_size=256, dim=32.
    key = jax.random.PRNGKey(0)
    k_w, k_q = jax.random.split(key)

    bank_size = 256
    dim = 32
    batch = 8

    # Buffers from __init__: W ~ randn(dim, bank_size); v is zeros and unused
    # in forward (only touched by update(), which is not part of forward).
    W = jax.random.normal(k_w, (dim, bank_size), dtype=jnp.float32)
    q = jax.random.normal(k_q, (batch, dim), dtype=jnp.float32)

    memory_bank, W_out, logit = caco_pn_forward(q, W)
    jax.block_until_ready((memory_bank, W_out, logit))

    # Reference check in plain JAX (torch F.normalize semantics).
    norm = jnp.sqrt(jnp.sum(W * W, axis=0, keepdims=True))
    mb_ref = W / jnp.maximum(norm, 1e-12)
    logit_ref = q @ mb_ref

    assert memory_bank.shape == (dim, bank_size)
    assert W_out.shape == (dim, bank_size)
    assert logit.shape == (batch, bank_size)
    assert jnp.allclose(memory_bank, mb_ref, atol=1e-5, rtol=1e-5)
    assert jnp.allclose(W_out, W)
    assert jnp.allclose(logit, logit_ref, atol=1e-4, rtol=1e-4)

    print("KERNEL_OK")
</pallas_src>

<mosaic_0001>
module attributes {stable_mosaic.version = 11 : i64} {
  func.func @_caco_kernel(%arg0: i32, %arg1: i32, %arg2: memref<8x32xf32, #tpu.memory_space<vmem>>, %arg3: memref<32x128xf32, #tpu.memory_space<vmem>>, %arg4: memref<32x128xf32, #tpu.memory_space<vmem>>, %arg5: memref<8x128xf32, #tpu.memory_space<vmem>>) attributes {dimension_semantics = [#tpu.dimension_semantics<parallel>, #tpu.dimension_semantics<arbitrary>], iteration_bounds = array<i64: 2, 1>, scalar_prefetch = 0 : i64, scratch_operands = 0 : i64, tpu.core_type = #tpu.core_type<tc>, window_params = [{transform_indices = @transform_0, window_bounds = array<i64: 8, 32>}, {transform_indices = @transform_1, window_bounds = array<i64: 32, 128>}, {transform_indices = @transform_2, window_bounds = array<i64: 32, 128>}, {transform_indices = @transform_3, window_bounds = array<i64: 8, 128>}]} {
    %c0 = arith.constant 0 : index
    %c0_0 = arith.constant 0 : index
    %0 = vector.load %arg3[%c0, %c0_0] : memref<32x128xf32, #tpu.memory_space<vmem>>, vector<32x128xf32>
    %1 = arith.mulf %0, %0 : vector<32x128xf32>
    %cst = arith.constant dense<0.000000e+00> : vector<128xf32>
    %2 = vector.multi_reduction <add>, %1, %cst [0] : vector<32x128xf32> to vector<128xf32>
    %3 = vector.shape_cast %2 : vector<128xf32> to vector<1x128xf32>
    %cst_1 = arith.constant 1.000000e-24 : f32
    %4 = vector.broadcast %cst_1 : f32 to vector<1x128xf32>
    %5 = arith.maximumf %3, %4 : vector<1x128xf32>
    %6 = math.rsqrt %5 : vector<1x128xf32>
    %c0_2 = arith.constant 0 : index
    %c0_3 = arith.constant 0 : index
    %7 = vector.load %arg2[%c0_2, %c0_3] : memref<8x32xf32, #tpu.memory_space<vmem>>, vector<8x32xf32>
    %cst_4 = arith.constant dense<0.000000e+00> : vector<8x128xf32>
    %8 = tpu.matmul %7, %0, %cst_4 {dimension_numbers = #tpu.dot_dimension_numbers<[1], [0], [0], [1], [0, 0, 1, 1], [], []>} : vector<8x32xf32>, vector<32x128xf32>, vector<8x128xf32> -> vector<8x128xf32>
    %c0_i32 = arith.constant 0 : i32
    %9 = arith.cmpi eq, %arg1, %c0_i32 : i32
    %10 = arith.extui %9 : i1 to i32
    %c0_i32_5 = arith.constant 0 : i32
    %11 = arith.cmpi ne, %10, %c0_i32_5 : i32
    scf.if %11 {
      %15 = vector.broadcast %6 : vector<1x128xf32> to vector<32x128xf32>
      %16 = arith.mulf %0, %15 : vector<32x128xf32>
      %c0_8 = arith.constant 0 : index
      %c0_9 = arith.constant 0 : index
      %17 = vector.load %arg4[%c0_8, %c0_9] : memref<32x128xf32, #tpu.memory_space<vmem>>, vector<32x128xf32>
      tpu.vector_store %arg4[%c0_8, %c0_9], %16 {strides = array<i32>} : memref<32x128xf32, #tpu.memory_space<vmem>>, vector<32x128xf32>,
    } else {
    }
    %12 = vector.broadcast %6 : vector<1x128xf32> to vector<8x128xf32>
    %13 = arith.mulf %8, %12 : vector<8x128xf32>
    %c0_6 = arith.constant 0 : index
    %c0_7 = arith.constant 0 : index
    %14 = vector.load %arg5[%c0_6, %c0_7] : memref<8x128xf32, #tpu.memory_space<vmem>>, vector<8x128xf32>
    tpu.vector_store %arg5[%c0_6, %c0_7], %13 {strides = array<i32>} : memref<8x128xf32, #tpu.memory_space<vmem>>, vector<8x128xf32>,
    return
  }
  func.func @transform_0(%arg0: i32, %arg1: i32) -> (i32, i32) {
    %c0_i32 = arith.constant 0 : i32
    %c0_i32_0 = arith.constant 0 : i32
    return %arg1, %c0_i32 : i32, i32
  }
  func.func @transform_1(%arg0: i32, %arg1: i32) -> (i32, i32) {
    %c0_i32 = arith.constant 0 : i32
    %c0_i32_0 = arith.constant 0 : i32
    return %c0_i32, %arg0 : i32, i32
  }
  func.func @transform_2(%arg0: i32, %arg1: i32) -> (i32, i32) {
    %c0_i32 = arith.constant 0 : i32
    %c0_i32_0 = arith.constant 0 : i32
    return %c0_i32, %arg0 : i32, i32
  }
  func.func @transform_3(%arg0: i32, %arg1: i32) -> (i32, i32) {
    %c0_i32 = arith.constant 0 : i32
    return %arg1, %arg0 : i32, i32
  }
}

</mosaic_0001>

<bundles_post_ra>
// kernel: tpu_custom_call.1
= control target key start
LH: loop header
LB: loop body
LE: loop exit
PB: predicated region body
PF: predicated region fallthrough
CT: control target
= control target key end

     0   :  { %s1036_s0 = inlined_call_operand.hbm [shape: f32[8,32], index: 0, kind: input, shape index: {}]   ;;  %s1037_s1 = inlined_call_operand.hbm [shape: f32[32,256], index: 1, kind: input, shape index: {}]   ;;  %s1038_s2 = inlined_call_operand.hbm [shape: f32[32,256], index: 2, kind: output, shape index: {0}]   ;;  %s1039_s3 = inlined_call_operand.hbm [shape: f32[8,256], index: 3, kind: output, shape index: {1}]  }
   0x1   :  { %1042 = sst [smem:[#allocation14_spill]] %s1036_s0 }
   0x2   :  { %9 = vsyncpa [#allocation3], 0 }
   0x3   :  { %10 = vsyncpa [#allocation6], 0 }
   0x4   :  { %12 = vsyncpa [#allocation6 + $0x1], 0 }
   0x5   :  { %13 = vsyncpa [#allocation4], 0 }
   0x6   :  { %15 = vsyncpa [#allocation4 + $0x1], 0 }
   0x7   :  { %16 = vsyncpa [#allocation9], 0 }
   0x8   :  { %18 = vsyncpa [#allocation9 + $0x1], 0  ;;  %s828_s12 = smov 0   ;;  %s830_s13 = smov 0  }
   0x9   :  { %s832_s14 = smov 0   ;;  %s834_s15 = smov 0  }
   0xa   :  { %s836_s16 = smov 0   ;;  %s838_s17 = smov 0  }
   0xb LB: > { %s503_s18 = sadd.s32 4294967295, %s794_s17   ;;  %s504_s19 = sadd.s32 4294967294, %s794_s17   ;;  %s794_s17 = sphi %s838_s17, %s24_s17   ;;  %s790_s16 = sphi %s836_s16, %s1060_s16   ;;  %s786_s15 = sphi %s834_s15, %s1059_s15   ;;  %s782_s14 = sphi %s832_s14, %s1058_s14   ;;  %s778_s13 = sphi %s830_s13, %s1057_s13   ;;  %s774_s12 = sphi %s828_s12, %s1056_s12  }
   0xc   : > { %s69_s20 = sadd.s32 1, %s782_s14  ;;  %p76_p0 = scmp.ne.s32.totalorder %s782_s14, %s778_s13 }
   0xd   : > { %p77_p1 = scmp.eq.s32.totalorder %s794_s17, 0  ;;  %p82_p2 = scmp.ne.s32.totalorder %s778_s13, %s774_s12 }
   0xe   : > { %p866_p3 = scmp.eq.s32.totalorder %s503_s18, 0  ;;  %p106_p4 = scmp.eq.s32.totalorder %s503_s18, 1 }
   0xf   : > { %p870_p5 = por %p77_p1, %p76_p0  ;;  %p112_p6 = scmp.eq.s32.totalorder %s504_s19, 1 }
  0x10   : > { %p876_p7 = por %p866_p3, %p82_p2  ;;  %p880_p8 = por %p106_p4, %p76_p0 }
  0x11   : > { %p884_p9 = por %p112_p6, %p82_p2  ;;  %p505_p10 = scmp.ge.s32.totalorder %s794_s17, 1 }
  0x12   : > { %s1045_s23 = scalar_select %p876_p7, 1, 0 }
  0x13   : > { %s1046_s24 = scalar_select %p880_p8, 1, 0 }
  0x14   : > { %s1047_s25 = scalar_select %p884_p9, 1, 0 }
  0x15   : > { %p147_p11 = scmp.lt.s32.totalorder %s794_s17, 3  ;;  %s796_s27 = smov [#allocation2]  }
  0x16   : > { %s162_s28 = sshll.u32 %s796_s27, 4  ;;  %p564_p1 = scmp.lt.s32.totalorder %s794_s17, 2  ;;  %s163_s28 = int_to_ptr.vmem [resolvable:$true] %s162_s28 }
  0x17   : > { %p891_p13 = pnand %p505_p10, %p147_p11  ;;  %s36_s4 = sadd.s32 1, %s790_s16 }
  0x18   : > { %p900_p4 = pnand %p564_p1, %p870_p5  ;;  %p38_p6 = scmp.ge.s32.totalorder %s36_s4, 2 }
  0x19   : > { %p548_p0 = pneg %p891_p13  ;;  %s173_s5 = sand.u32 1, %s782_s14  }
  0x1a   : > { %s637_s6 = scalar_lea.vmem %s163_s28, 128  ;;  %p645_p8 = scmp.lt.s32.totalorder %s163_s28, %s163_s28 }
  0x1b   : > { %p906_p2 = pnand %p548_p0, %p866_p3  ;;  %p638_p11 = scmp.ne.s32.totalorder %s163_s28, %s637_s6 }
  0x1c   : > { %p646_p5 = scmp.lt.s32.totalorder %s637_s6, %s637_s6 }
  0x1d   : > { %p628_p10 = pneg %p906_p2 }
  0x1e   : > { %p647_p1 = por %p646_p5, %p645_p8 }
  0x1f   : > { %p640_p12 = pnand %p638_p11, %p628_p10 }
  0x21   : > { %p641_p9 = pneg %p640_p12 }
  0x23   : > { %p648_p7 = pnand %p647_p1, %p641_p9 }
  0x25   : > { %651 = shalt.err (!%p648_p7)
}
  0x26   : > { %s1051_s0 = sld [smem:[#allocation14_spill]]  ;;  %s1062_s4 = smov (%p38_p6, %s36_s4), 0 }
  0x27   : > { %s508_s9 = sshll.u32 %s173_s5, 5  ;;  %s66_s10 = ssub.s32 %s790_s16, %s1062_s4 }
  0x28   : > { %p67_p12 = scmp.eq.s32.totalorder %s66_s10, 0  ;;  %s509_s11 = sshll.u32 %s790_s16, 7 }
  0x29   : > { %s182_s22 = scalar_lea.hbm %s1037_s1, %s509_s11  ;;  %s177_s27 = scalar_lea.vmem [#allocation5], %s508_s9 }
  0x2a   : > { %s183_s30 = sshll.u32 %s177_s27, 4  ;;  %s174_s7 = scalar_lea.sflag [#allocation6], %s173_s5  ;;  %s184_s30 = int_to_ptr.vmem [resolvable:$true] %s183_s30 }
  0x2b   : > { %s930_s6 = scalar_select %p67_p12, %s782_s14, %s69_s20  }
  0x2c   : > { %551 = dma.hbm_to_vmem [thread:$0]  (!%p906_p2), %s1051_s0, 128, %s163_s28, [#allocation3]  }
  0x2d   : > { %p654_p7 = pneg %p900_p4  ;;  %s665_s28 = scalar_lea.vmem %s184_s30, 512 }
  0x2e   : > { %p666_p8 = scmp.ne.s32.totalorder %s184_s30, %s665_s28  ;;  %s797_s8 = smov [#allocation5]  }
  0x2f   : > { %s670_s10 = sshll.u32 %s797_s8, 4  ;;  %s671_s10 = int_to_ptr.vmem [resolvable:$false] %s670_s10 }
  0x30   : > { %p668_p9 = pnand %p666_p8, %p654_p7  ;;  %s672_s0 = scalar_lea.vmem %s671_s10, 1024 }
  0x31   : > { %p673_p2 = scmp.lt.s32.totalorder %s184_s30, %s671_s10  ;;  %p674_p6 = scmp.lt.s32.totalorder %s672_s0, %s665_s28 }
  0x32   : > { %p669_p0 = pneg %p668_p9 }
  0x33   : > { %p675_p10 = por %p674_p6, %p673_p2 }
  0x35   : > { %p676_p11 = pnand %p675_p10, %p669_p0 }
  0x37   : > { %679 = shalt.err (!%p676_p11)
}
  0x38   : > { %s798_s9 = smov 256   ;;  %s799_s20 = smov 128  }
  0x39   : > { %s800_s11 = smov 8   ;;  %195 = sbr.rel (%p891_p13) target bundleno = 284 (0x11c), region = 28 }
  0x3a   : > { %555 = dma.hbm_to_vmem [thread:$0]  (!%p900_p4), %s182_s22, 512, %s184_s30, %s174_s7, %s798_s9, %s799_s20, %s800_s11  }
  0x3e   : > { %757 = dma.done.wait (%p866_p3), [#allocation3], 128  }
  0x3f   : > { %759 = vsyncadd (%p866_p3), [#allocation3], 4294967168  ;;  %s943_s0 = sand.u32 1, %s778_s13   ;;  %p1052_p4 = scmp.ne.s32.totalorder %s1045_s23, 0 }
  0x40   : > { %s512_s5 = sshll.u32 %s943_s0, 5  ;;  %s202_s18 = scalar_lea.sflag [#allocation6], %s943_s0 }
  0x41   : > { %s205_s29 = scalar_lea.vmem [#allocation5], %s512_s5 }
  0x42   : > { %761 = dma.done.wait (%p1052_p4), %s202_s18, 512  }
  0x43   : > { %763 = vsyncadd (%p1052_p4), %s202_s18, 4294966784  ;;  %v801_v0 = vmov 0.0   ;;  %vm802_vm0 = vmmov 0   ;;  %v236_v1 = vld [vmem:[%s205_s29 + $0x18] sm:$0xff]  ;;  %v235_v2 = vld [vmem:[%s205_s29 + $0x10] sm:$0xff]  ;;  %vm253_vm1 = vcmask 261120  }
  0x44   : > { %527 = vmatprep.subr.mxu0 %v801_v0  ;;  %535 = vmatprep.mubr.msk.f32.mxu0 %vm802_vm0, %v801_v0  ;;  %v234_v3 = vld [vmem:[%s205_s29 + $0x8] sm:$0xff]  ;;  %v233_v5 = vld [vmem:[%s205_s29] sm:$0xff]  ;;  %v239_v6 = vmul.f32 %v235_v2, %v235_v2  ;;  %v240_v8 = vmul.f32 %v236_v1, %v236_v1  ;;  %v252_v10 = vld [vmem:[#allocation2] sm:$0xff]  ;;  %s225_s21 = scalar_lea.vmem [#allocation7], %s512_s5  ;;  %s518_s26 = sshll.u32 %s786_s15, 7 }
  0x45   : > { %528 = vmatpush3.msra.mxu0 %v236_v1  ;;  %v238_v4 = vmul.f32 %v234_v3, %v234_v3  ;;  %v237_v7 = vmul.f32 %v233_v5, %v233_v5  ;;  %s359_s23 = sshll.u32 %s225_s21, 4  ;;  %s963_s27 = scalar_lea.hbm %s1038_s2, %s518_s26  ;;  %s955_s23 = int_to_ptr.vmem [resolvable:$true] %s359_s23 }
  0x46   : > { %529 = vmatprep.subr.mxu0 %v801_v0  ;;  %s342_s30 = scalar_lea.sflag [#allocation4], %s943_s0  ;;  %s680_s7 = scalar_lea.vmem %s955_s23, 512 }
  0x47   : > { %530 = vmatpush3.msra.mxu0 %v235_v2  ;;  %v241_v9 = vadd.f32 %v238_v4, %v237_v7  ;;  %p681_p3 = scmp.ne.s32.totalorder %s955_s23, %s680_s7  ;;  %p1053_p13 = scmp.ne.s32.totalorder %s1046_s24, 0 }
  0x48   : > { %531 = vmatprep.subr.mxu0 %v801_v0  ;;  %s803_s28 = smov [#allocation7]  }
  0x49   : > { %532 = vmatpush3.msra.mxu0 %v234_v3  ;;  %v242_v11 = vadd.f32 %v241_v9, %v239_v6  ;;  %p682_p5 = pnand %p681_p3, %p1053_p13  ;;  %s684_s8 = sshll.u32 %s803_s28, 4  ;;  %s685_s8 = int_to_ptr.vmem [resolvable:$false] %s684_s8 }
  0x4a   : > { %533 = vmatprep.subr.mxu0 %v801_v0  ;;  %s686_s10 = scalar_lea.vmem %s685_s8, 1024  ;;  %p687_p12 = scmp.lt.s32.totalorder %s955_s23, %s685_s8 }
  0x4b   : > { %534 = vmatpush3.msra.mxu0 %v233_v5  ;;  %v243_v12 = vadd.f32 %v242_v11, %v240_v8  ;;  %p683_p1 = pneg %p682_p5  ;;  %p688_p7 = scmp.lt.s32.totalorder %s686_s10, %s680_s7 }
  0x4c   : > { %536 = vmatmul.mubr.msk.f32.vlgmr.msra.gmra.mxu0 %vm253_vm1, %v252_v10 }
  0x4d   : > { %v244_v13 = vrot.slane %v243_v12, 4  ;;  %p689_p8 = por %p688_p7, %p687_p12 }
  0x4f   : > { %v245_v14 = vadd.f32 %v244_v13, %v243_v12  ;;  %p690_p9 = pnand %p689_p8, %p683_p1 }
  0x51   : > { %v246_v15 = vrot.slane %v245_v14, 2 }
  0x53   : > { %v247_v16 = vadd.f32 %v246_v15, %v245_v14 }
  0x55   : > { %v248_v17 = vrot.slane %v247_v16, 1 }
  0x57   : > { %v249_v18 = vadd.f32 %v248_v17, %v247_v16 }
  0x59   : > { %v250_v19 = vmax.f32 %v249_v18, 1e-24 }
  0x5b   : > { %624 = vrsqrt.f32 %v250_v19 }
  0x68   : > { %v625_v20 = vpop.eup %624 }
  0x69   : > { %v331_v21 = vmul.f32 %v625_v20, %v233_v5  ;;  %v332_v22 = vmul.f32 %v625_v20, %v234_v3  ;;  %v333_v23 = vmul.f32 %v625_v20, %v235_v2  ;;  %v334_v24 = vmul.f32 %v625_v20, %v236_v1 }
  0x6b   : > { %335 = vst [vmem:[%s225_s21] sm:$0xff] %v331_v21  ;;  %336 = vst [vmem:[%s225_s21 + $0x8] sm:$0xff] %v332_v22 }
  0x6c   : > { %337 = vst [vmem:[%s225_s21 + $0x10] sm:$0xff] %v333_v23  ;;  %338 = vst [vmem:[%s225_s21 + $0x18] sm:$0xff] %v334_v24 }
  0x6d   : > { %693 = shalt.err (!%p690_p9)
}
  0x6e   : > { %s694_s9 = scalar_lea.hbm %s963_s27, 512  ;;  %s698_s5 = scalar_lea.hbm %s1038_s2, 1024 }
  0x6f   : > { %p695_p0 = scmp.ne.s32.totalorder %s963_s27, %s694_s9  ;;  %p699_p10 = scmp.lt.s32.totalorder %s963_s27, %s1038_s2 }
  0x70   : > { %p700_p11 = scmp.lt.s32.totalorder %s698_s5, %s694_s9 }
  0x71   : > { %p696_p2 = pnand %p695_p0, %p1053_p13 }
  0x72   : > { %p701_p4 = por %p700_p11, %p699_p10 }
  0x73   : > { %p697_p6 = pneg %p696_p2 }
  0x75   : > { %p702_p3 = pnand %p701_p4, %p697_p6 }
  0x77   : > { %705 = shalt.err (!%p702_p3)
}
  0x78   : > { %s804_s21 = smov 128   ;;  %s805_s19 = smov 256  }
  0x79   : > { %s806_s22 = smov 8   ;;  %s514_s7 = sshll.u32 %s943_s0, 3 }
  0x7a   : > { %544 = dma.vmem_to_hbm [thread:$0]  (%p1053_p13), %s955_s23, 512, %s963_s27, %s342_s30, %s804_s21, %s805_s19, %s806_s22  }
  0x7b   : > { %s232_s28 = scalar_lea.vmem [#allocation8], %s514_s7  ;;  %s994_s20 = scalar_lea.hbm %s1039_s3, %s518_s26 }
  0x7c   : > { %s377_s8 = sshll.u32 %s232_s28, 4  ;;  %s347_s11 = scalar_lea.sflag [#allocation9], %s943_s0  ;;  %s378_s8 = int_to_ptr.vmem [resolvable:$true] %s377_s8 }
  0x7d   : > { %s706_s5 = scalar_lea.vmem %s378_s8, 128  ;;  %s807_s23 = smov [#allocation8]  }
  0x7e   : > { %p707_p5 = scmp.ne.s32.totalorder %s378_s8, %s706_s5  ;;  %s710_s27 = sshll.u32 %s807_s23, 4  ;;  %s711_s27 = int_to_ptr.vmem [resolvable:$false] %s710_s27 }
  0x7f   : > { %s712_s30 = scalar_lea.vmem %s711_s27, 256  ;;  %p713_p7 = scmp.lt.s32.totalorder %s378_s8, %s711_s27 }
  0x80   : > { %p708_p1 = pnand %p707_p5, %p1053_p13  ;;  %p714_p8 = scmp.lt.s32.totalorder %s712_s30, %s706_s5 }
  0x82   : > { %p709_p12 = pneg %p708_p1  ;;  %p715_p9 = por %p714_p8, %p713_p7 }
  0x84   : > { %p716_p0 = pnand %p715_p9, %p709_p12 }
 0x10c   : > { %v323_v25 = vpop.f32.mrf.mxu0 }
 0x10d   : > { %v339_v26 = vmul.f32 %v625_v20, %v323_v25 }
 0x10e   : > { %v537_v27 = vpop.f32.mrf.mxu0 }
 0x10f   : > { %340 = vst [vmem:[%s232_s28] sm:$0xff] %v339_v26 }
 0x110   : > { %719 = shalt.err (!%p716_p0)
}
 0x111   : > { %s720_s15 = scalar_lea.hbm %s994_s20, 128  ;;  %s724_s18 = scalar_lea.hbm %s1039_s3, 256 }
 0x112   : > { %p721_p2 = scmp.ne.s32.totalorder %s994_s20, %s720_s15  ;;  %p725_p11 = scmp.lt.s32.totalorder %s994_s20, %s1039_s3 }
 0x113   : > { %p726_p4 = scmp.lt.s32.totalorder %s724_s18, %s720_s15 }
 0x114   : > { %p722_p6 = pnand %p721_p2, %p1053_p13 }
 0x115   : > { %p727_p3 = por %p726_p4, %p725_p11 }
 0x116   : > { %p723_p10 = pneg %p722_p6 }
 0x118   : > { %p728_p5 = pnand %p727_p3, %p723_p10 }
 0x11a   : > { %731 = shalt.err (!%p728_p5)
}
 0x11b   : > { %545 = dma.vmem_to_hbm [thread:$0]  (%p1053_p13), %s378_s8, 128, %s994_s20, %s347_s11  }
 0x11c PF: > { %s389_s19 = sand.u32 1, %s774_s12   ;;  %p1054_p1 = scmp.ne.s32.totalorder %s1047_s25, 0 }
 0x11d   : > { %p1055_p12 = scmp.ge.s32.totalorder %s794_s17, 2  ;;  %s390_s22 = scalar_lea.sflag [#allocation4], %s389_s19 }
 0x11f   : > { %p557_p7 = pnand %p1055_p12, %p1054_p1 }
 0x121   : > { %p558_p8 = pneg %p557_p7 }
 0x123   : > { %765 = dma.done.wait (%p558_p8), %s390_s22, 512  }
 0x124   : > { %767 = vsyncadd (%p558_p8), %s390_s22, 4294966784  ;;  %s399_s7 = scalar_lea.sflag [#allocation9], %s389_s19 }
 0x125   : > { %769 = dma.done.wait (%p558_p8), %s399_s7, 128  }
 0x126   : > { %771 = vsyncadd (%p558_p8), %s399_s7, 4294967168  ;;  %s24_s17 = sadd.s32 1, %s794_s17   ;;  %s1056_s12 = smov %s778_s13 }
 0x127   : > { %p21_p9 = scmp.ge.s32.totalorder %s24_s17, 4   ;;  %s1057_s13 = smov %s782_s14 }
 0x128   : > { %s1058_s14 = smov %s930_s6  ;;  %s1059_s15 = smov %s790_s16 }
 0x129   : > { %s1060_s16 = smov %s1062_s4  ;;  %23 = sbr.rel (!%p21_p9) target bundleno = 11 (0xb), region = 100 }
 0x12e   :  { %404 = vsyncpa [#allocation3], 1 }
 0x12f   :  { %406 = vsyncpa [#allocation3 + $0x1], 1 }
 0x130   :  { %407 = vsyncpa [#allocation6], 1 }
 0x131   :  { %409 = vsyncpa [#allocation6 + $0x1], 1 }
 0x132   :  { %410 = vsyncpa [#allocation4], 1 }
 0x133   :  { %412 = vsyncpa [#allocation4 + $0x1], 1 }
 0x134   :  { %413 = vsyncpa [#allocation9], 1 }
 0x135   :  { %415 = vsyncpa [#allocation9 + $0x1], 1 }

</bundles_post_ra>
